<compile_context>
chip_gen: v7x
topology: tpu7x:2x2x1
jax: 0.10.0
libtpu: 0.0.40
codegen_flags: <defaults>
</compile_context>

<pallas_src>
import functools

import jax
import jax.numpy as jnp
from jax.experimental import pallas as pl
from jax.experimental.pallas import tpu as pltpu


def _round_up(n, m):
    return ((n + m - 1) // m) * m


def _vmem_capacity_bytes():
    """Physical VMEM per core (128 MiB on v5e/v6e, 64 MiB on v7x)."""
    try:
        cap = getattr(pltpu.get_tpu_info(), "vmem_capacity_bytes", None)
        if cap:
            return int(cap)
    except Exception:
        pass
    return 64 * 1024 * 1024            # conservative (v7x) fallback


def _step_vmem_bytes(TB, TH, W, K9C, C1P, NCP):
    """Honest per-grid-step VMEM footprint (lane/sublane padded, x2 buffers)."""
    lane = lambda n: _round_up(n, 128)
    sub = lambda n: _round_up(n, 8)
    M = TB * TH * W
    x_block = 2 * TB * sub(TH * W) * lane(K9C) * 2      # double-buffered bf16 patches
    w_blocks = 2 * (sub(K9C) * lane(C1P) * 2            # conv weight (bf16)
                    + 8 * lane(C1P) * 4                 # conv bias (f32, 8-sublane pad)
                    + sub(C1P) * lane(NCP) * 2          # fc weight (bf16)
                    + 8 * lane(NCP) * 4)                # fc bias (f32)
    o_block = 2 * sub(TB) * lane(NCP) * 4               # double-buffered f32 logits
    conv_tmp = sub(M) * lane(C1P) * 4                   # f32 conv activations (value)
    lhs_tmp = sub(M) * lane(K9C) * 2                    # bf16 lhs value
    pool = 2 * sub(TB) * lane(C1P) * 4                  # pooled scratch + temp
    return x_block + w_blocks + o_block + conv_tmp + lhs_tmp + pool


def _choose_tiling(B, H, W, K9C, C1P, NCP, budget):
    """Pick (TB, TH): largest batch block and row-chunk fitting the budget."""
    # TH candidates: divisors of H with sublane-aligned chunks (or the full H).
    th_cands = [d for d in range(H, 0, -1)
                if H % d == 0 and (d == H or (d * W) % 8 == 0)]
    tb_pref = max(1, min(B, 8))
    tb_cands = list(dict.fromkeys(tb for tb in (tb_pref, 4, 2, 1)
                                  if 1 <= tb <= tb_pref))
    best = None
    for tb in tb_cands:                    # prefer the largest batch block
        for th in th_cands:                # then the largest row chunk
            fp = _step_vmem_bytes(tb, th, W, K9C, C1P, NCP)
            if best is None or fp < best[2]:
                best = (tb, th, fp)
            if fp <= budget:
                return tb, th, fp
    return best                            # nothing fits: minimal footprint


# ---------------------------------------------------------------------------
# Fused kernel: one K=9C conv matmul + bias + ReLU + pooled accumulation;
# FC head applied on the last row-chunk of each batch block.
# ---------------------------------------------------------------------------
def fused_backbone_kernel(x_ref, w_ref, cb_ref, fcw_ref, fcb_ref, o_ref,
                          pool_ref, *, TB, THW, C1P, inv_hw):
    # x_ref   : [TB, THW, 9C]   pre-interleaved conv patches for this chunk (bf16)
    # w_ref   : [9C, C1P]       conv weight (bf16)
    # cb_ref  : [1, C1P]        conv bias (f32)
    # fcw_ref : [C1P, NCP]      FC weight (bf16)
    # fcb_ref : [1, NCP]        FC bias (f32)
    # o_ref   : [TB, NCP]       logits for this batch block (f32)
    # pool_ref: [TB, C1P]       running per-image channel sums (f32 scratch)
    ch = pl.program_id(1)

    @pl.when(ch == 0)
    def _init():
        pool_ref[...] = jnp.zeros_like(pool_ref)

    # Single K=9C contraction on the MXU; f32 accumulator produced once.
    lhs = x_ref[...].reshape(TB * THW, x_ref.shape[-1])
    conv = jnp.dot(lhs, w_ref[...], preferred_element_type=jnp.float32)
    conv = jnp.maximum(conv + cb_ref[...], 0.0)                  # bias + ReLU (f32)

    # Per-image partial global-average-pool (sublane reduction per batch row).
    pool_ref[...] += jnp.sum(conv.reshape(TB, THW, C1P), axis=1)

    @pl.when(ch == pl.num_programs(1) - 1)
    def _finalize():
        pooled = pool_ref[...] * inv_hw                          # mean = sum * 1/(H*W)
        logits = jnp.dot(pooled.astype(fcw_ref.dtype), fcw_ref[...],
                         preferred_element_type=jnp.float32) + fcb_ref[...]
        o_ref[...] = logits.astype(o_ref.dtype)                  # lane-dense store


def base_model_forward(x, params, *, mxu_dtype=jnp.bfloat16):
    """Equivalent of BaseModel.forward: x[N, in_chans, H, W] -> [N, num_classes]."""
    B, C, H, W = x.shape
    conv_w, conv_b, fc_w, fc_b = (params["conv_w"], params["conv_b"],
                                  params["fc_w"], params["fc_b"])
    C1 = conv_w.shape[0]
    NC = fc_w.shape[1]
    C1P = _round_up(C1, 128)          # lane-dense hidden channels
    NCP = _round_up(NC, 128)          # lane-dense logits
    K9C = 9 * C

    # Generation-aware chunk budget + honest VMEM accounting.
    cap = _vmem_capacity_bytes()
    budget = (16 << 20) if cap >= (100 << 20) else (4 << 20)
    TB, TH, footprint = _choose_tiling(B, H, W, K9C, C1P, NCP, budget)
    Bp = _round_up(B, TB)
    THW = TH * W
    NCH = H // TH

    vmem_limit = max(32 << 20, footprint + (4 << 20))
    vmem_limit = min(vmem_limit, (3 * cap) // 4)       # <=48 MiB on v7x, <=96 MiB v5e/v6e
    vmem_limit = max(vmem_limit, footprint)

    # -- wrapper-side prep (cheap XLA): 9C patch pre-interleave, bf16 ---------
    x_nhwc = jnp.transpose(x, (0, 2, 3, 1))                         # [B, H, W, C]
    x_nhwc = jnp.pad(x_nhwc, ((0, Bp - B), (1, 1), (1, 1), (0, 0)))  # batch + spatial pad
    patches = jnp.concatenate(
        [x_nhwc[:, dh:dh + H, dw:dw + W, :] for dh in range(3) for dw in range(3)],
        axis=-1).reshape(Bp, H * W, K9C).astype(mxu_dtype)          # [Bp, H*W, 9C]

    # conv weight: [C1, C, 3, 3] -> [9C, C1P]; row index = (dh*3+dw)*C + c.
    w9 = jnp.transpose(conv_w, (2, 3, 1, 0)).reshape(K9C, C1)
    w9 = jnp.pad(w9, ((0, 0), (0, C1P - C1))).astype(mxu_dtype)
    cb = jnp.pad(conv_b, (0, C1P - C1)).reshape(1, C1P).astype(jnp.float32)
    fcw = jnp.pad(fc_w, ((0, C1P - C1), (0, NCP - NC))).astype(mxu_dtype)
    fcb = jnp.pad(fc_b, (0, NCP - NC)).reshape(1, NCP).astype(jnp.float32)

    kernel = functools.partial(fused_backbone_kernel, TB=TB, THW=THW, C1P=C1P,
                               inv_hw=float(1.0 / (H * W)))

    flops = 2 * Bp * H * W * K9C * C1P + 2 * Bp * C1P * NCP
    bytes_accessed = int(patches.size * patches.dtype.itemsize
                         + (w9.size + fcw.size) * 2
                         + (cb.size + fcb.size + Bp * NCP) * 4)

    out = pl.pallas_call(
        kernel,
        out_shape=jax.ShapeDtypeStruct((Bp // TB, TB, NCP), jnp.float32),
        grid=(Bp // TB, NCH),                    # (batch blocks, row chunks)
        in_specs=[
            # one pipelined patch chunk per grid step (no halo needed)
            pl.BlockSpec((TB, THW, K9C), lambda b, ch: (b, ch, 0)),
            # small weights / biases: full blocks, constant index (no re-DMA)
            pl.BlockSpec((K9C, C1P), lambda b, ch: (0, 0)),
            pl.BlockSpec((1, C1P), lambda b, ch: (0, 0)),
            pl.BlockSpec((C1P, NCP), lambda b, ch: (0, 0)),
            pl.BlockSpec((1, NCP), lambda b, ch: (0, 0)),
        ],
        # output revisited across the chunk axis; written on the last chunk
        out_specs=pl.BlockSpec((None, TB, NCP), lambda b, ch: (b, 0, 0)),
        scratch_shapes=[pltpu.VMEM((TB, C1P), jnp.float32)],
        compiler_params=pltpu.CompilerParams(
            dimension_semantics=("parallel", "arbitrary"),
            vmem_limit_bytes=int(vmem_limit)),
        cost_estimate=pl.CostEstimate(flops=flops, transcendentals=0,
                                      bytes_accessed=bytes_accessed),
    )(patches, w9, cb, fcw, fcb)

    return out.reshape(Bp, NCP)[:B, :NC]


def init_params(in_chans, num_classes, hidden=32, seed=42):
    k = jax.random.PRNGKey(seed)
    k1, k2, k3, k4 = jax.random.split(k, 4)
    conv_w = jax.random.normal(k1, (hidden, in_chans, 3, 3), jnp.float32) * 0.1
    conv_b = jax.random.normal(k2, (hidden,), jnp.float32) * 0.01
    fc_w = jax.random.normal(k3, (hidden, num_classes), jnp.float32) * 0.1
    fc_b = jax.random.normal(k4, (num_classes,), jnp.float32) * 0.01
    return {"conv_w": conv_w, "conv_b": conv_b, "fc_w": fc_w, "fc_b": fc_b}


def reference_forward(x, params):
    """Pure-JAX f32 reference of the same synthetic backbone."""
    conv_w, conv_b, fc_w, fc_b = (params["conv_w"], params["conv_b"],
                                  params["fc_w"], params["fc_b"])
    y = jax.lax.conv_general_dilated(
        x, conv_w, window_strides=(1, 1), padding="SAME",
        dimension_numbers=("NCHW", "OIHW", "NCHW"))
    y = jnp.maximum(y + conv_b[None, :, None, None], 0.0)
    pooled = jnp.mean(y, axis=(2, 3))
    return pooled @ fc_w + fc_b[None, :]


if __name__ == "__main__":
    B, in_chans, H, W = 2, 4, 16, 16
    num_classes = 8

    x = jax.random.normal(jax.random.PRNGKey(0), (B, in_chans, H, W), jnp.float32)
    params = init_params(in_chans, num_classes)

    out = base_model_forward(x, params)
    jax.block_until_ready(out)

    assert out.shape == (B, num_classes), out.shape
    assert out.dtype == jnp.float32

    ref = reference_forward(x, params)
    err = float(jnp.max(jnp.abs(out - ref)))
    assert err < 5e-2, f"max abs error vs reference: {err}"

    print("KERNEL_OK")
</pallas_src>

<mosaic_0001>
module attributes {stable_mosaic.version = 11 : i64} {
  func.func @fused_backbone_kernel(%arg0: i32, %arg1: i32, %arg2: memref<2x256x36xbf16, #tpu.memory_space<vmem>>, %arg3: memref<36x128xbf16, #tpu.memory_space<vmem>>, %arg4: memref<1x128xf32, #tpu.memory_space<vmem>>, %arg5: memref<128x128xbf16, #tpu.memory_space<vmem>>, %arg6: memref<1x128xf32, #tpu.memory_space<vmem>>, %arg7: memref<1x2x128xf32, #tpu.memory_space<vmem>>, %arg8: memref<2x128xf32, #tpu.memory_space<vmem>>) attributes {dimension_semantics = [#tpu.dimension_semantics<parallel>, #tpu.dimension_semantics<arbitrary>], iteration_bounds = array<i64: 1, 1>, scalar_prefetch = 0 : i64, scratch_operands = 1 : i64, tpu.core_type = #tpu.core_type<tc>, window_params = [{transform_indices = @transform_0, window_bounds = array<i64: 2, 256, 36>}, {pipeline_mode = #tpu.pipeline_mode<synchronous>, transform_indices = @transform_1, window_bounds = array<i64: 36, 128>}, {pipeline_mode = #tpu.pipeline_mode<synchronous>, transform_indices = @transform_2, window_bounds = array<i64: 1, 128>}, {pipeline_mode = #tpu.pipeline_mode<synchronous>, transform_indices = @transform_3, window_bounds = array<i64: 128, 128>}, {pipeline_mode = #tpu.pipeline_mode<synchronous>, transform_indices = @transform_4, window_bounds = array<i64: 1, 128>}, {transform_indices = @transform_5, window_bounds = array<i64: 1, 2, 128>}]} {
    %c0_i32 = arith.constant 0 : i32
    %0 = arith.cmpi eq, %arg1, %c0_i32 : i32
    %1 = arith.extui %0 : i1 to i32
    %c0_i32_0 = arith.constant 0 : i32
    %2 = arith.cmpi ne, %1, %c0_i32_0 : i32
    scf.if %2 {
      %cst_15 = arith.constant 0.000000e+00 : f32
      %20 = vector.broadcast %cst_15 : f32 to vector<2x128xf32>
      %c0_16 = arith.constant 0 : index
      %c0_17 = arith.constant 0 : index
      %21 = vector.load %arg8[%c0_16, %c0_17] : memref<2x128xf32, #tpu.memory_space<vmem>>, vector<2x128xf32>
      tpu.vector_store %arg8[%c0_16, %c0_17], %20 {strides = array<i32>} : memref<2x128xf32, #tpu.memory_space<vmem>>, vector<2x128xf32>,
    } else {
    }
    %c0 = arith.constant 0 : index
    %c0_1 = arith.constant 0 : index
    %c0_2 = arith.constant 0 : index
    %3 = vector.load %arg2[%c0, %c0_1, %c0_2] : memref<2x256x36xbf16, #tpu.memory_space<vmem>>, vector<2x256x36xbf16>
    %4 = vector.shape_cast %3 : vector<2x256x36xbf16> to vector<512x36xbf16>
    %c0_3 = arith.constant 0 : index
    %c0_4 = arith.constant 0 : index
    %5 = vector.load %arg3[%c0_3, %c0_4] : memref<36x128xbf16, #tpu.memory_space<vmem>>, vector<36x128xbf16>
    %cst = arith.constant dense<0.000000e+00> : vector<512x128xf32>
    %6 = tpu.matmul %4, %5, %cst {dimension_numbers = #tpu.dot_dimension_numbers<[1], [0], [0], [1], [0, 0, 1, 1], [], []>} : vector<512x36xbf16>, vector<36x128xbf16>, vector<512x128xf32> -> vector<512x128xf32>
    %c0_5 = arith.constant 0 : index
    %c0_6 = arith.constant 0 : index
    %7 = vector.load %arg4[%c0_5, %c0_6] : memref<1x128xf32, #tpu.memory_space<vmem>>, vector<1x128xf32>
    %8 = vector.broadcast %7 : vector<1x128xf32> to vector<512x128xf32>
    %9 = arith.addf %6, %8 : vector<512x128xf32>
    %cst_7 = arith.constant 0.000000e+00 : f32
    %10 = vector.broadcast %cst_7 : f32 to vector<512x128xf32>
    %11 = arith.maximumf %9, %10 : vector<512x128xf32>
    %c0_8 = arith.constant 0 : index
    %c0_9 = arith.constant 0 : index
    %12 = vector.load %arg8[%c0_8, %c0_9] : memref<2x128xf32, #tpu.memory_space<vmem>>, vector<2x128xf32>
    %13 = vector.shape_cast %11 : vector<512x128xf32> to vector<2x256x128xf32>
    %cst_10 = arith.constant dense<0.000000e+00> : vector<2x128xf32>
    %14 = vector.multi_reduction <add>, %13, %cst_10 [1] : vector<2x256x128xf32> to vector<2x128xf32>
    %15 = arith.addf %12, %14 : vector<2x128xf32>
    %c0_11 = arith.constant 0 : index
    %c0_12 = arith.constant 0 : index
    %16 = vector.load %arg8[%c0_11, %c0_12] : memref<2x128xf32, #tpu.memory_space<vmem>>, vector<2x128xf32>
    tpu.vector_store %arg8[%c0_11, %c0_12], %15 {strides = array<i32>} : memref<2x128xf32, #tpu.memory_space<vmem>>, vector<2x128xf32>,
    %c0_i32_13 = arith.constant 0 : i32
    %17 = arith.cmpi eq, %arg1, %c0_i32_13 : i32
    %18 = arith.extui %17 : i1 to i32
    %c0_i32_14 = arith.constant 0 : i32
    %19 = arith.cmpi ne, %18, %c0_i32_14 : i32
    scf.if %19 {
      %c0_15 = arith.constant 0 : index
      %c0_16 = arith.constant 0 : index
      %20 = vector.load %arg8[%c0_15, %c0_16] : memref<2x128xf32, #tpu.memory_space<vmem>>, vector<2x128xf32>
      %cst_17 = arith.constant 3.906250e-03 : f32
      %21 = vector.broadcast %cst_17 : f32 to vector<2x128xf32>
      %22 = arith.mulf %20, %21 : vector<2x128xf32>
      %23 = arith.truncf %22 : vector<2x128xf32> to vector<2x128xbf16>
      %c0_18 = arith.constant 0 : index
      %c0_19 = arith.constant 0 : index
      %24 = vector.load %arg5[%c0_18, %c0_19] : memref<128x128xbf16, #tpu.memory_space<vmem>>, vector<128x128xbf16>
      %cst_20 = arith.constant dense<0.000000e+00> : vector<2x128xf32>
      %25 = tpu.matmul %23, %24, %cst_20 {dimension_numbers = #tpu.dot_dimension_numbers<[1], [0], [0], [1], [0, 0, 1, 1], [], []>} : vector<2x128xbf16>, vector<128x128xbf16>, vector<2x128xf32> -> vector<2x128xf32>
      %c0_21 = arith.constant 0 : index
      %c0_22 = arith.constant 0 : index
      %26 = vector.load %arg6[%c0_21, %c0_22] : memref<1x128xf32, #tpu.memory_space<vmem>>, vector<1x128xf32>
      %27 = vector.broadcast %26 : vector<1x128xf32> to vector<2x128xf32>
      %28 = arith.addf %25, %27 : vector<2x128xf32>
      %c0_23 = arith.constant 0 : index
      %c0_24 = arith.constant 0 : index
      %c0_25 = arith.constant 0 : index
      %29 = vector.load %arg7[%c0_23, %c0_24, %c0_25] : memref<1x2x128xf32, #tpu.memory_space<vmem>>, vector<1x2x128xf32>
      %30 = vector.shape_cast %29 : vector<1x2x128xf32> to vector<2x128xf32>
      %31 = vector.shape_cast %28 : vector<2x128xf32> to vector<1x2x128xf32>
      tpu.vector_store %arg7[%c0_23, %c0_24, %c0_25], %31 {strides = array<i32>} : memref<1x2x128xf32, #tpu.memory_space<vmem>>, vector<1x2x128xf32>,
    } else {
    }
    return
  }
  func.func @transform_0(%arg0: i32, %arg1: i32) -> (i32, i32, i32) {
    %c0_i32 = arith.constant 0 : i32
    %c0_i32_0 = arith.constant 0 : i32
    return %arg0, %arg1, %c0_i32 : i32, i32, i32
  }
  func.func @transform_1(%arg0: i32, %arg1: i32) -> (i32, i32) {
    %c0_i32 = arith.constant 0 : i32
    %c0_i32_0 = arith.constant 0 : i32
    %c0_i32_1 = arith.constant 0 : i32
    return %c0_i32, %c0_i32_0 : i32, i32
  }
  func.func @transform_2(%arg0: i32, %arg1: i32) -> (i32, i32) {
    %c0_i32 = arith.constant 0 : i32
    %c0_i32_0 = arith.constant 0 : i32
    %c0_i32_1 = arith.constant 0 : i32
    return %c0_i32, %c0_i32_0 : i32, i32
  }
  func.func @transform_3(%arg0: i32, %arg1: i32) -> (i32, i32) {
    %c0_i32 = arith.constant 0 : i32
    %c0_i32_0 = arith.constant 0 : i32
    %c0_i32_1 = arith.constant 0 : i32
    return %c0_i32, %c0_i32_0 : i32, i32
  }
  func.func @transform_4(%arg0: i32, %arg1: i32) -> (i32, i32) {
    %c0_i32 = arith.constant 0 : i32
    %c0_i32_0 = arith.constant 0 : i32
    %c0_i32_1 = arith.constant 0 : i32
    return %c0_i32, %c0_i32_0 : i32, i32
  }
  func.func @transform_5(%arg0: i32, %arg1: i32) -> (i32, i32, i32) {
    %c0_i32 = arith.constant 0 : i32
    %c0_i32_0 = arith.constant 0 : i32
    %c0_i32_1 = arith.constant 0 : i32
    return %arg0, %c0_i32, %c0_i32_0 : i32, i32, i32
  }
}

</mosaic_0001>

<bundles_post_ra>
// kernel: tpu_custom_call.1
= control target key start
LH: loop header
LB: loop body
LE: loop exit
PB: predicated region body
PF: predicated region fallthrough
CT: control target
= control target key end

     0   :  { %vm278_vm0 = vcmask 293888   ;;  %vm375_vm1 = vcmask 1041408   ;;  %s1611_s0 = inlined_call_operand.vmem [shape: bf16[2,256,36], index: 0, kind: input, shape index: {}]   ;;  %s1612_s1 = inlined_call_operand.vmem [shape: bf16[36,128], index: 1, kind: input, shape index: {}]   ;;  %s1613_s2 = inlined_call_operand.vmem [shape: f32[1,128], index: 2, kind: input, shape index: {}]   ;;  %s1614_s3 = inlined_call_operand.vmem [shape: bf16[128,128], index: 3, kind: input, shape index: {}]   ;;  %s1615_s4 = inlined_call_operand.vmem [shape: f32[1,128], index: 4, kind: input, shape index: {}]   ;;  %s1616_s5 = inlined_call_operand.hbm [shape: f32[1,2,128], index: 5, kind: output, shape index: {}]  }
   0x1   :  { %v1168_v0 = vld [vmem:[%s1612_s1] sm:$0xff]   ;;  %v1169_v1 = vld [vmem:[%s1612_s1 + $0x8] sm:$0xff]   ;;  %v1170_v2 = vld [vmem:[%s1612_s1 + $0x10] ss:$0 sps:$4 sm:$0x33]  }
   0x2   :  { %1067 = vmatprep.subr.bf16.mxu0 %v1168_v0  ;;  %v1171_v3 = vld [vmem:[%s1611_s0] sm:$0xff]   ;;  %1157 = vmatprep.subr.bf16.mxu1 %v1168_v0  ;;  %v377_v4 = vsel %vm375_vm1, %v1170_v2, 0  ;;  %v1172_v5 = vld [vmem:[%s1611_s0 + $0x8] sm:$0xff]   ;;  %v1173_v6 = vld [vmem:[%s1611_s0 + $0x10] sm:$0xff]  }
   0x3   :  { %1068 = vmatpush3.bf16.msra.mxu0 %v1168_v0  ;;  %1160 = vmatpush3.bf16.msra.mxu1 %v1168_v0  ;;  %v1174_v7 = vld [vmem:[%s1611_s0 + $0x18] sm:$0xff]   ;;  %v1175_v8 = vld [vmem:[%s1611_s0 + $0x20] sm:$0xff]   ;;  %v1189_v9 = vld [vmem:[%s1611_s0 + $0x90] sm:$0xff]  }
   0x4   :  { %1069 = vmatprep.subr.bf16.mxu0 %v1169_v1  ;;  %1073 = vmatprep.mubr.msk.bf16.mxu0 %vm278_vm0, %v1171_v3  ;;  %v1190_v10 = vld [vmem:[%s1611_s0 + $0x98] sm:$0xff]   ;;  %v1191_v11 = vld [vmem:[%s1611_s0 + $0xa0] sm:$0xff]   ;;  %v1176_v12 = vld [vmem:[%s1611_s0 + $0x28] sm:$0xff]  }
   0x5   :  { %1158 = vmatprep.subr.bf16.mxu1 %v1169_v1  ;;  %1109 = vmatprep.mubr.msk.bf16.mxu1 %vm278_vm0, %v1189_v9  ;;  %v1177_v13 = vld [vmem:[%s1611_s0 + $0x30] sm:$0xff]   ;;  %v1192_v14 = vld [vmem:[%s1611_s0 + $0xa8] sm:$0xff]   ;;  %v1178_v16 = vld [vmem:[%s1611_s0 + $0x38] sm:$0xff]  }
   0x6   :  { %v1193_v15 = vld [vmem:[%s1611_s0 + $0xb0] sm:$0xff]   ;;  %v1179_v17 = vld [vmem:[%s1611_s0 + $0x40] sm:$0xff]   ;;  %v1194_v18 = vld [vmem:[%s1611_s0 + $0xb8] sm:$0xff]  }
   0x7   :  { %1070 = vmatpush3.bf16.msra.mxu0 %v1169_v1  ;;  %1161 = vmatpush3.bf16.msra.mxu1 %v1169_v1  ;;  %v1195_v19 = vld [vmem:[%s1611_s0 + $0xc0] sm:$0xff]  }
   0x8   :  { %1163 = vmatprep.subr.msk.bf16.mxu0 %vm375_vm1, %v1170_v2  ;;  %1164 = vmatprep.subr.msk.bf16.mxu1 %vm375_vm1, %v1170_v2 }
   0xb   :  { %1072 = vmatpush3.bf16.msra.mxu0 %v377_v4  ;;  %1162 = vmatpush3.bf16.msra.mxu1 %v377_v4 }
   0xe   :  { %1074 = vmatmul.mubr.msk.bf16.vlgmr.msra.gmra.mrb[0].mxu0 %vm278_vm0, %v1172_v5  ;;  %1110 = vmatmul.mubr.msk.bf16.vlgmr.msra.gmra.mrb[0].mxu1 %vm278_vm0, %v1190_v10 }
   0xf   :  { %1077 = vmatprep.mubr.msk.bf16.mxu0 %vm278_vm0, %v1173_v6  ;;  %1113 = vmatprep.mubr.msk.bf16.mxu1 %vm278_vm0, %v1191_v11 }
  0x16   :  { %1078 = vmatmul.mubr.msk.bf16.gmra.mrb[4].mxu0 %vm278_vm0, %v1174_v7  ;;  %1114 = vmatmul.mubr.msk.bf16.gmra.mrb[4].mxu1 %vm278_vm0, %v1192_v14 }
  0x17   :  { %1081 = vmatprep.mubr.msk.bf16.mxu0 %vm278_vm0, %v1175_v8  ;;  %1117 = vmatprep.mubr.msk.bf16.mxu1 %vm278_vm0, %v1193_v15 }
  0x1e   :  { %1082 = vmatmul.mubr.msk.bf16.gmra.mrb[8].mxu0 %vm278_vm0, %v1176_v12  ;;  %1118 = vmatmul.mubr.msk.bf16.gmra.mrb[8].mxu1 %vm278_vm0, %v1194_v18 }
  0x1f   :  { %1085 = vmatprep.mubr.msk.bf16.mxu0 %vm278_vm0, %v1177_v13 }
  0x26   :  { %1086 = vmatmul.mubr.msk.bf16.gmra.mrb[12].mxu0 %vm278_vm0, %v1178_v16 }
  0x27   :  { %1089 = vmatprep.mubr.msk.bf16.mxu0 %vm278_vm0, %v1179_v17 }
  0x28   :  { %10 = vsyncpa [#allocation4], 0  ;;  %1121 = vmatprep.mubr.msk.bf16.mxu1 %vm278_vm0, %v1195_v19  ;;  %v1180_v20 = vld [vmem:[%s1611_s0 + $0x48] sm:$0xff]   ;;  %v1181_v21 = vld [vmem:[%s1611_s0 + $0x50] sm:$0xff]   ;;  %v1235_v37 = vmov 0.0   ;;  %vm1236_vm2 = vmmov 0  }
  0x29   :  { %v1196_v22 = vld [vmem:[%s1611_s0 + $0xc8] sm:$0xff]   ;;  %v1197_v23 = vld [vmem:[%s1611_s0 + $0xd0] sm:$0xff]   ;;  %v1182_v24 = vld [vmem:[%s1611_s0 + $0x58] sm:$0xff]   ;;  %1137 = vmatprep.subr.bf16.mxu1 %v1235_v37  ;;  %26 = vst [vmem:[#allocation2] sm:$0x3] %v1235_v37  ;;  %vm809_vm3 = vcmask 1041409  }
  0x2a   :  { %1122 = vmatmul.mubr.msk.bf16.gmra.mrb[12].mxu1 %vm278_vm0, %v1196_v22  ;;  %v1183_v25 = vld [vmem:[%s1611_s0 + $0x60] sm:$0xff]   ;;  %v1198_v26 = vld [vmem:[%s1611_s0 + $0xd8] sm:$0xff]   ;;  %v1184_v28 = vld [vmem:[%s1611_s0 + $0x68] sm:$0xff]   ;;  %s1237_s27 = smov [#allocation3]  }
  0x2b   :  { %1125 = vmatprep.mubr.msk.bf16.mxu1 %vm278_vm0, %v1197_v23  ;;  %v1199_v27 = vld [vmem:[%s1611_s0 + $0xe0] sm:$0xff]   ;;  %v1185_v29 = vld [vmem:[%s1611_s0 + $0x70] sm:$0xff]   ;;  %v1200_v30 = vld [vmem:[%s1611_s0 + $0xe8] sm:$0xff]   ;;  %s938_s1 = sshll.u32 %s1237_s27, 4  ;;  %s939_s1 = int_to_ptr.vmem [resolvable:$true] %s938_s1 }
  0x2c   :  { %v1201_v31 = vld [vmem:[%s1611_s0 + $0xf0] sm:$0xff]   ;;  %v1186_v32 = vld [vmem:[%s1611_s0 + $0x78] sm:$0xff]   ;;  %v1187_v33 = vld [vmem:[%s1611_s0 + $0x80] sm:$0xff]   ;;  %s1211_s28 = scalar_lea.vmem %s939_s1, 32  ;;  %p1216_p1 = scmp.lt.s32.totalorder %s939_s1, %s939_s1 }
  0x2d   :  { %v1202_v34 = vld [vmem:[%s1611_s0 + $0xf8] sm:$0xff]   ;;  %v1188_v35 = vld [vmem:[%s1611_s0 + $0x88] sm:$0xff]   ;;  %v1203_v36 = vld [vmem:[%s1614_s3] sm:$0xff]   ;;  %p1212_p0 = scmp.ne.s32.totalorder %s939_s1, %s1211_s28  ;;  %p1217_p2 = scmp.lt.s32.totalorder %s1211_s28, %s1211_s28 }
  0x2e   :  { %1090 = vmatmul.mubr.msk.bf16.gmra.mrb[16].mxu0 %vm278_vm0, %v1180_v20  ;;  %1138 = vmatpush3.bf16.msra.mxu1 %v1203_v36  ;;  %v1204_v38 = vld [vmem:[%s1614_s3 + $0x8] sm:$0xff]   ;;  %v1205_v39 = vld [vmem:[%s1614_s3 + $0x10] sm:$0xff]   ;;  %v1421_v40 = vld [vmem:[%s1613_s2] ss:$0 sm:$0xff] }
  0x2f   :  { %1093 = vmatprep.mubr.msk.bf16.mxu0 %vm278_vm0, %v1181_v21  ;;  %1139 = vmatprep.subr.bf16.mxu1 %v1235_v37  ;;  %v1206_v3 = vld [vmem:[%s1614_s3 + $0x18] sm:$0xff]   ;;  %v1207_v11 = vld [vmem:[%s1614_s3 + $0x20] sm:$0xff]   ;;  %p1218_p3 = por %p1217_p2, %p1216_p1 }
  0x31   :  { %p1219_p4 = pnand %p1218_p3, %p1212_p0 }
  0x32   :  { %1126 = vmatmul.mubr.msk.bf16.gmra.mrb[16].mxu1 %vm278_vm0, %v1198_v26 }
  0x33   :  { %1129 = vmatprep.mubr.msk.bf16.mxu1 %vm278_vm0, %v1199_v27  ;;  %1140 = vmatpush3.bf16.msra.mxu1 %v1204_v38 }
  0x34   :  { %1141 = vmatprep.subr.bf16.mxu1 %v1235_v37 }
  0x36   :  { %1094 = vmatmul.mubr.msk.bf16.gmra.mrb[20].mxu0 %vm278_vm0, %v1182_v24 }
  0x37   :  { %1097 = vmatprep.mubr.msk.bf16.mxu0 %vm278_vm0, %v1183_v25  ;;  %1142 = vmatpush3.bf16.msra.mxu1 %v1205_v39  ;;  %v1208_v25 = vld [vmem:[%s1614_s3 + $0x28] sm:$0xff]  }
  0x38   :  { %1143 = vmatprep.subr.bf16.mxu1 %v1235_v37 }
  0x3a   :  { %1130 = vmatmul.mubr.msk.bf16.gmra.mrb[20].mxu1 %vm278_vm0, %v1200_v30  ;;  %v1209_v30 = vld [vmem:[%s1614_s3 + $0x30] sm:$0xff]  }
  0x3b   :  { %1133 = vmatprep.mubr.msk.bf16.mxu1 %vm278_vm0, %v1201_v31  ;;  %1144 = vmatpush3.bf16.msra.mxu1 %v1206_v3 }
  0x3c   :  { %1145 = vmatprep.subr.bf16.mxu1 %v1235_v37 }
  0x3e   :  { %1098 = vmatmul.mubr.msk.bf16.gmra.mrb[24].mxu0 %vm278_vm0, %v1184_v28 }
  0x3f   :  { %1101 = vmatprep.mubr.msk.bf16.mxu0 %vm278_vm0, %v1185_v29  ;;  %1146 = vmatpush3.bf16.msra.mxu1 %v1207_v11 }
  0x40   :  { %1147 = vmatprep.subr.bf16.mxu1 %v1235_v37 }
  0x42   :  { %1134 = vmatmul.mubr.msk.bf16.gmra.mrb[24].mxu1 %vm278_vm0, %v1202_v34 }
  0x43   :  { %1148 = vmatpush3.bf16.msra.mxu1 %v1208_v25  ;;  %1153 = vmatprep.mubr.msk.bf16.mxu1 %vm1236_vm2, %v1235_v37 }
  0x44   :  { %1149 = vmatprep.subr.bf16.mxu1 %v1235_v37 }
  0x46   :  { %1102 = vmatmul.mubr.msk.bf16.gmra.mrb[28].mxu0 %vm278_vm0, %v1186_v32 }
  0x47   :  { %1105 = vmatprep.mubr.msk.bf16.mxu0 %vm278_vm0, %v1187_v33  ;;  %1150 = vmatpush3.bf16.msra.mxu1 %v1209_v30 }
  0x48   :  { %1151 = vmatprep.subr.bf16.mxu1 %v1235_v37 }
  0x4e   :  { %1106 = vmatmul.mubr.msk.bf16.gmra.mrb[32].mxu0 %vm278_vm0, %v1188_v35 }
  0xe1   :  { %v1075_v41 = vpop.f32.mrb[0].mxu0  ;;  %v1429_v59 = vpop.f32.mrb[0].mxu1 }
  0xe2   :  { %v413_v42 = vpop.f32.mrb[1].mxu0  ;;  %v422_v46 = vadd.f32 %v1075_v41, %v1421_v40  ;;  %v1431_v61 = vpop.f32.mrb[1].mxu1 }
  0xe3   :  { %v414_v43 = vadd.f32 %v1421_v40, %v413_v42  ;;  %v1076_v44 = vpop.f32.mrb[2].mxu0  ;;  %v1435_v2 = vpop.f32.mrb[2].mxu1  ;;  %v1210_v42 = vld [vmem:[%s1614_s3 + $0x38] sm:$0xff]  }
  0xe4   :  { %v416_v45 = vpop.f32.mrb[3].mxu0  ;;  %v425_v49 = vadd.f32 %v1076_v44, %v1421_v40  ;;  %v670_v51 = vmax.f32 %v422_v46, 0.0  ;;  %v1440_v4 = vpop.f32.mrb[3].mxu1  ;;  %1152 = vmatpush3.bf16.msra.mxu1 %v1210_v42 }
  0xe5   :  { %v417_v47 = vadd.f32 %v1421_v40, %v416_v45  ;;  %v668_v48 = vmax.f32 %v414_v43, 0.0 }
  0xe6   :  { %v671_v55 = vmax.f32 %v425_v49, 0.0 }
  0xe7   :  { %v669_v50 = vmax.f32 %v417_v47, 0.0 }
  0xe9   :  { %v733_v52 = vadd.f32 %v669_v50, %v668_v48  ;;  %v1079_v53 = vpop.f32.mrb[4].mxu0  ;;  %v1448_v17 = vpop.f32.mrb[4].mxu1 }
  0xea   :  { %v429_v54 = vpop.f32.mrb[5].mxu0  ;;  %v438_v62 = vadd.f32 %v1079_v53, %v1421_v40  ;;  %v1450_v19 = vpop.f32.mrb[5].mxu1 }
  0xeb   :  { %v734_v56 = vadd.f32 %v733_v52, %v670_v51  ;;  %v430_v57 = vadd.f32 %v1421_v40, %v429_v54  ;;  %v1080_v58 = vpop.f32.mrb[6].mxu0  ;;  %v1455_v24 = vpop.f32.mrb[6].mxu1 }
  0xec   :  { %v432_v60 = vpop.f32.mrb[7].mxu0  ;;  %v441_v6 = vadd.f32 %v1080_v58, %v1421_v40  ;;  %v674_v8 = vmax.f32 %v438_v62, 0.0  ;;  %v1460_v26 = vpop.f32.mrb[7].mxu1 }
  0xed   :  { %v672_v63 = vmax.f32 %v430_v57, 0.0  ;;  %v735_v0 = vadd.f32 %v734_v56, %v671_v55  ;;  %v433_v1 = vadd.f32 %v1421_v40, %v432_v60 }
  0xee   :  { %v675_v13 = vmax.f32 %v441_v6, 0.0 }
  0xef   :  { %v736_v5 = vadd.f32 %v735_v0, %v672_v63  ;;  %v673_v7 = vmax.f32 %v433_v1, 0.0 }
  0xf1   :  { %v737_v9 = vadd.f32 %v736_v5, %v673_v7  ;;  %v1083_v10 = vpop.f32.mrb[8].mxu0  ;;  %v1469_v41 = vpop.f32.mrb[8].mxu1 }
  0xf2   :  { %v445_v12 = vpop.f32.mrb[9].mxu0  ;;  %v454_v20 = vadd.f32 %v1083_v10, %v1421_v40  ;;  %v1474_v44 = vpop.f32.mrb[9].mxu1 }
  0xf3   :  { %v738_v14 = vadd.f32 %v737_v9, %v674_v8  ;;  %v446_v15 = vadd.f32 %v1421_v40, %v445_v12  ;;  %v1084_v16 = vpop.f32.mrb[10].mxu0  ;;  %v1479_v49 = vpop.f32.mrb[10].mxu1 }
  0xf4   :  { %v448_v18 = vpop.f32.mrb[11].mxu0  ;;  %v457_v28 = vadd.f32 %v1084_v16, %v1421_v40  ;;  %v678_v31 = vmax.f32 %v454_v20, 0.0  ;;  %v1481_v50 = vpop.f32.mrb[11].mxu1 }
  0xf5   :  { %v676_v21 = vmax.f32 %v446_v15, 0.0  ;;  %v739_v22 = vadd.f32 %v738_v14, %v675_v13  ;;  %v449_v23 = vadd.f32 %v1421_v40, %v448_v18 }
  0xf6   :  { %v679_v35 = vmax.f32 %v457_v28, 0.0 }
  0xf7   :  { %v740_v27 = vadd.f32 %v739_v22, %v676_v21  ;;  %v677_v29 = vmax.f32 %v449_v23, 0.0 }
  0xf9   :  { %v741_v32 = vadd.f32 %v740_v27, %v677_v29  ;;  %v1087_v33 = vpop.f32.mrb[12].mxu0 }
  0xfa   :  { %v461_v34 = vpop.f32.mrb[13].mxu0  ;;  %v470_v45 = vadd.f32 %v1087_v33, %v1421_v40 }
  0xfb   :  { %v742_v36 = vadd.f32 %v741_v32, %v678_v31  ;;  %v462_v38 = vadd.f32 %v1421_v40, %v461_v34  ;;  %v1088_v39 = vpop.f32.mrb[14].mxu0 }
  0xfc   :  { %v464_v43 = vpop.f32.mrb[15].mxu0  ;;  %v473_v52 = vadd.f32 %v1088_v39, %v1421_v40  ;;  %v682_v54 = vmax.f32 %v470_v45, 0.0 }
  0xfd   :  { %v680_v46 = vmax.f32 %v462_v38, 0.0  ;;  %v743_v47 = vadd.f32 %v742_v36, %v679_v35  ;;  %v465_v48 = vadd.f32 %v1421_v40, %v464_v43  ;;  %v1485_v63 = vpop.f32.mrb[12].mxu1 }
  0xfe   :  { %v683_v37 = vmax.f32 %v473_v52, 0.0  ;;  %v1487_v1 = vpop.f32.mrb[13].mxu1 }
  0xff   :  { %v744_v51 = vadd.f32 %v743_v47, %v680_v46  ;;  %v681_v53 = vmax.f32 %v465_v48, 0.0  ;;  %v1491_v8 = vpop.f32.mrb[14].mxu1 }
 0x100   :  { %v1493_v9 = vpop.f32.mrb[15].mxu1 }
 0x101   :  { %v745_v55 = vadd.f32 %v744_v51, %v681_v53  ;;  %v1091_v56 = vpop.f32.mrb[16].mxu0 }
 0x102   :  { %v477_v57 = vpop.f32.mrb[17].mxu0  ;;  %v486_v3 = vadd.f32 %v1091_v56, %v1421_v40 }
 0x103   :  { %v746_v58 = vadd.f32 %v745_v55, %v682_v54  ;;  %v478_v60 = vadd.f32 %v1421_v40, %v477_v57  ;;  %v1092_v62 = vpop.f32.mrb[18].mxu0 }
 0x104   :  { %v480_v0 = vpop.f32.mrb[19].mxu0  ;;  %v489_v11 = vadd.f32 %v1092_v62, %v1421_v40  ;;  %v686_v13 = vmax.f32 %v486_v3, 0.0 }
 0x105   :  { %v684_v5 = vmax.f32 %v478_v60, 0.0  ;;  %v747_v6 = vadd.f32 %v746_v58, %v683_v37  ;;  %v481_v7 = vadd.f32 %v1421_v40, %v480_v0  ;;  %v1497_v23 = vpop.f32.mrb[16].mxu1 }
 0x106   :  { %v687_v18 = vmax.f32 %v489_v11, 0.0  ;;  %v1499_v27 = vpop.f32.mrb[17].mxu1 }
 0x107   :  { %v748_v10 = vadd.f32 %v747_v6, %v684_v5  ;;  %v685_v12 = vmax.f32 %v481_v7, 0.0  ;;  %v1503_v32 = vpop.f32.mrb[18].mxu1 }
 0x108   :  { %v1505_v33 = vpop.f32.mrb[19].mxu1 }
 0x109   :  { %v749_v14 = vadd.f32 %v748_v10, %v685_v12  ;;  %v1095_v15 = vpop.f32.mrb[20].mxu0 }
 0x10a   :  { %v493_v16 = vpop.f32.mrb[21].mxu0  ;;  %v502_v28 = vadd.f32 %v1095_v15, %v1421_v40 }
 0x10b   :  { %v750_v20 = vadd.f32 %v749_v14, %v686_v13  ;;  %v494_v21 = vadd.f32 %v1421_v40, %v493_v16  ;;  %v1096_v22 = vpop.f32.mrb[22].mxu0 }
 0x10c   :  { %v496_v25 = vpop.f32.mrb[23].mxu0  ;;  %v505_v35 = vadd.f32 %v1096_v22, %v1421_v40  ;;  %v690_v38 = vmax.f32 %v502_v28, 0.0 }
 0x10d   :  { %v688_v29 = vmax.f32 %v494_v21, 0.0  ;;  %v751_v30 = vadd.f32 %v750_v20, %v687_v18  ;;  %v497_v31 = vadd.f32 %v1421_v40, %v496_v25  ;;  %v1509_v51 = vpop.f32.mrb[20].mxu1 }
 0x10e   :  { %v691_v45 = vmax.f32 %v505_v35, 0.0  ;;  %v1511_v53 = vpop.f32.mrb[21].mxu1 }
 0x10f   :  { %v752_v34 = vadd.f32 %v751_v30, %v688_v29  ;;  %v689_v36 = vmax.f32 %v497_v31, 0.0  ;;  %v1515_v37 = vpop.f32.mrb[22].mxu1 }
 0x110   :  { %v1517_v58 = vpop.f32.mrb[23].mxu1 }
 0x111   :  { %v753_v39 = vadd.f32 %v752_v34, %v689_v36  ;;  %v1099_v42 = vpop.f32.mrb[24].mxu0 }
 0x112   :  { %v509_v43 = vpop.f32.mrb[25].mxu0  ;;  %v518_v54 = vadd.f32 %v1099_v42, %v1421_v40 }
 0x113   :  { %v754_v46 = vadd.f32 %v753_v39, %v690_v38  ;;  %v510_v47 = vadd.f32 %v1421_v40, %v509_v43  ;;  %v1100_v48 = vpop.f32.mrb[26].mxu0 }
 0x114   :  { %v512_v52 = vpop.f32.mrb[27].mxu0  ;;  %v521_v62 = vadd.f32 %v1100_v48, %v1421_v40  ;;  %v694_v3 = vmax.f32 %v518_v54, 0.0 }
 0x115   :  { %v692_v55 = vmax.f32 %v510_v47, 0.0  ;;  %v755_v56 = vadd.f32 %v754_v46, %v691_v45  ;;  %v513_v57 = vadd.f32 %v1421_v40, %v512_v52  ;;  %v1521_v14 = vpop.f32.mrb[24].mxu1 }
 0x116   :  { %v695_v10 = vmax.f32 %v521_v62, 0.0  ;;  %v1523_v16 = vpop.f32.mrb[25].mxu1 }
 0x117   :  { %v756_v60 = vadd.f32 %v755_v56, %v692_v55  ;;  %v693_v0 = vmax.f32 %v513_v57, 0.0  ;;  %v1527_v25 = vpop.f32.mrb[26].mxu1  ;;  %v558_v57 = vadd.f32 %v1421_v40, %v1431_v61  ;;  %v574_v61 = vadd.f32 %v1421_v40, %v1450_v19 }
 0x118   :  { %v1529_v28 = vpop.f32.mrb[27].mxu1  ;;  %v590_v19 = vadd.f32 %v1421_v40, %v1474_v44  ;;  %v606_v44 = vadd.f32 %v1421_v40, %v1487_v1  ;;  %v622_v1 = vadd.f32 %v1421_v40, %v1499_v27  ;;  %v638_v27 = vadd.f32 %v1421_v40, %v1511_v53 }
 0x119   :  { %v757_v5 = vadd.f32 %v756_v60, %v693_v0  ;;  %v1103_v6 = vpop.f32.mrb[28].mxu0  ;;  %v654_v53 = vadd.f32 %v1421_v40, %v1523_v16 }
 0x11a   :  { %v525_v7 = vpop.f32.mrb[29].mxu0  ;;  %v534_v18 = vadd.f32 %v1103_v6, %v1421_v40  ;;  %v561_v6 = vadd.f32 %v1421_v40, %v1440_v4  ;;  %v577_v4 = vadd.f32 %v1421_v40, %v1460_v26  ;;  %v593_v26 = vadd.f32 %v1421_v40, %v1481_v50 }
 0x11b   :  { %v758_v11 = vadd.f32 %v757_v5, %v694_v3  ;;  %v526_v12 = vadd.f32 %v1421_v40, %v525_v7  ;;  %v1104_v13 = vpop.f32.mrb[30].mxu0  ;;  %v704_v5 = vmax.f32 %v558_v57, 0.0  ;;  %v566_v7 = vadd.f32 %v1429_v59, %v1421_v40 }
 0x11c   :  { %v528_v15 = vpop.f32.mrb[31].mxu0  ;;  %v537_v30 = vadd.f32 %v1104_v13, %v1421_v40  ;;  %v698_v34 = vmax.f32 %v534_v18, 0.0  ;;  %v705_v13 = vmax.f32 %v561_v6, 0.0  ;;  %v582_v59 = vadd.f32 %v1448_v17, %v1421_v40 }
 0x11d   :  { %v696_v20 = vmax.f32 %v526_v12, 0.0  ;;  %v759_v21 = vadd.f32 %v758_v11, %v695_v10  ;;  %v529_v22 = vadd.f32 %v1421_v40, %v528_v15  ;;  %v569_v12 = vadd.f32 %v1435_v2, %v1421_v40 }
 0x11e   :  { %v699_v39 = vmax.f32 %v537_v30, 0.0  ;;  %v706_v15 = vmax.f32 %v566_v7, 0.0  ;;  %v585_v2 = vadd.f32 %v1455_v24, %v1421_v40  ;;  %v598_v17 = vadd.f32 %v1469_v41, %v1421_v40 }
 0x11f   :  { %v760_v29 = vadd.f32 %v759_v21, %v696_v20  ;;  %v697_v31 = vmax.f32 %v529_v22, 0.0  ;;  %v707_v20 = vmax.f32 %v569_v12, 0.0  ;;  %v708_v22 = vmax.f32 %v574_v61, 0.0 }
 0x120   :  { %v601_v24 = vadd.f32 %v1479_v49, %v1421_v40  ;;  %v609_v50 = vadd.f32 %v1421_v40, %v1493_v9  ;;  %v614_v41 = vadd.f32 %v1485_v63, %v1421_v40  ;;  %v617_v49 = vadd.f32 %v1491_v8, %v1421_v40 }
 0x121   :  { %v761_v35 = vadd.f32 %v760_v29, %v697_v31  ;;  %v1107_v36 = vpop.f32.mrb[32].mxu0  ;;  %v709_v31 = vmax.f32 %v577_v4, 0.0  ;;  %v720_v6 = vmax.f32 %v622_v1, 0.0  ;;  %v625_v9 = vadd.f32 %v1421_v40, %v1505_v33 }
 0x122   :  { %v541_v38 = vpop.f32.mrb[33].mxu0  ;;  %v550_v48 = vadd.f32 %v1107_v36, %v1421_v40  ;;  %v711_v36 = vmax.f32 %v585_v2, 0.0  ;;  %v630_v63 = vadd.f32 %v1497_v23, %v1421_v40  ;;  %v633_v8 = vadd.f32 %v1503_v32, %v1421_v40 }
 0x123   :  { %v762_v42 = vadd.f32 %v761_v35, %v698_v34  ;;  %v542_v43 = vadd.f32 %v1421_v40, %v541_v38  ;;  %v1108_v45 = vpop.f32.mrb[34].mxu0  ;;  %v710_v34 = vmax.f32 %v582_v59, 0.0  ;;  %v641_v33 = vadd.f32 %v1421_v40, %v1517_v58 }
 0x124   :  { %v544_v46 = vpop.f32.mrb[35].mxu0  ;;  %v553_v55 = vadd.f32 %v1108_v45, %v1421_v40  ;;  %v702_v60 = vmax.f32 %v550_v48, 0.0  ;;  %v713_v45 = vmax.f32 %v593_v26, 0.0  ;;  %v722_v12 = vmax.f32 %v630_v63, 0.0 }
 0x125   :  { %v1533_v47 = vadd.f32 %v762_v42, %v699_v39  ;;  %v545_v52 = vadd.f32 %v1421_v40, %v544_v46  ;;  %v700_v54 = vmax.f32 %v542_v43, 0.0  ;;  %v712_v39 = vmax.f32 %v590_v19, 0.0 }
 0x126   :  { %v703_v0 = vmax.f32 %v553_v55, 0.0  ;;  %v714_v46 = vmax.f32 %v598_v17, 0.0  ;;  %v716_v55 = vmax.f32 %v606_v44, 0.0  ;;  %v723_v61 = vmax.f32 %v633_v8, 0.0 }
 0x127   :  { %v701_v56 = vmax.f32 %v545_v52, 0.0  ;;  %v715_v52 = vmax.f32 %v601_v24, 0.0  ;;  %v646_v23 = vadd.f32 %v1509_v51, %v1421_v40  ;;  %v649_v32 = vadd.f32 %v1515_v37, %v1421_v40 }
 0x128   :  { %v728_v2 = vmax.f32 %v654_v53, 0.0  ;;  %v657_v58 = vadd.f32 %v1421_v40, %v1529_v28  ;;  %v662_v51 = vadd.f32 %v1521_v14, %v1421_v40  ;;  %v665_v37 = vadd.f32 %v1527_v25, %v1421_v40 }
 0x129   :  { %v770_v62 = vadd.f32 %v701_v56, %v700_v54  ;;  %v726_v4 = vmax.f32 %v646_v23, 0.0 }
 0x12b   :  { %v771_v3 = vadd.f32 %v770_v62, %v702_v60  ;;  %v717_v60 = vmax.f32 %v609_v50, 0.0  ;;  %v718_v62 = vmax.f32 %v614_v41, 0.0  ;;  %v1014_v41 = vld [vmem:[%s1615_s4] ss:$0 sm:$0xff] }
 0x12d   :  { %v772_v10 = vadd.f32 %v771_v3, %v703_v0  ;;  %v719_v3 = vmax.f32 %v617_v49, 0.0 }
 0x12f   :  { %v773_v11 = vadd.f32 %v772_v10, %v704_v5 }
 0x131   :  { %v774_v18 = vadd.f32 %v773_v11, %v705_v13  ;;  %v721_v11 = vmax.f32 %v625_v9, 0.0 }
 0x133   :  { %v775_v21 = vadd.f32 %v774_v18, %v706_v15  ;;  %v724_v18 = vmax.f32 %v638_v27, 0.0 }
 0x135   :  { %v776_v29 = vadd.f32 %v775_v21, %v707_v20 }
 0x137   :  { %v777_v30 = vadd.f32 %v776_v29, %v708_v22  ;;  %v725_v22 = vmax.f32 %v641_v33, 0.0  ;;  %v727_v29 = vmax.f32 %v649_v32, 0.0 }
 0x139   :  { %v778_v35 = vadd.f32 %v777_v30, %v709_v31  ;;  %v764_v31 = vrot.slane %v1533_v47, 4 }
 0x13b   :  { %v779_v38 = vadd.f32 %v778_v35, %v710_v34  ;;  %v729_v35 = vmax.f32 %v657_v58, 0.0  ;;  %v765_v16 = vadd.f32 %v764_v31, %v1533_v47 }
 0x13d   :  { %v780_v42 = vadd.f32 %v779_v38, %v711_v36  ;;  %v730_v36 = vmax.f32 %v662_v51, 0.0  ;;  %v766_v17 = vrot.slane %v765_v16, 2 }
 0x13f   :  { %v781_v43 = vadd.f32 %v780_v42, %v712_v39  ;;  %v731_v39 = vmax.f32 %v665_v37, 0.0 }
 0x141   :  { %v782_v48 = vadd.f32 %v781_v43, %v713_v45  ;;  %v767_v43 = vadd.f32 %v766_v17, %v765_v16 }
 0x143   :  { %v783_v54 = vadd.f32 %v782_v48, %v714_v46  ;;  %v768_v44 = vrot.slane %v767_v43, 1 }
 0x145   :  { %v784_v56 = vadd.f32 %v783_v54, %v715_v52  ;;  %v769_v48 = vadd.f32 %v768_v44, %v767_v43  ;;  %v732_v52 = vld [vmem:[#allocation2] sm:$0x3] }
 0x147   :  { %v785_v57 = vadd.f32 %v784_v56, %v716_v55 }
 0x149   :  { %v786_v0 = vadd.f32 %v785_v57, %v717_v60 }
 0x14b   :  { %v787_v5 = vadd.f32 %v786_v0, %v718_v62 }
 0x14d   :  { %v788_v7 = vadd.f32 %v787_v5, %v719_v3 }
 0x14f   :  { %v789_v10 = vadd.f32 %v788_v7, %v720_v6 }
 0x151   :  { %v790_v13 = vadd.f32 %v789_v10, %v721_v11 }
 0x153   :  { %v791_v15 = vadd.f32 %v790_v13, %v722_v12 }
 0x155   :  { %v792_v20 = vadd.f32 %v791_v15, %v723_v61 }
 0x157   :  { %v793_v21 = vadd.f32 %v792_v20, %v724_v18 }
 0x159   :  { %v794_v59 = vadd.f32 %v793_v21, %v725_v22 }
 0x15b   :  { %v795_v30 = vadd.f32 %v794_v59, %v726_v4 }
 0x15d   :  { %v796_v19 = vadd.f32 %v795_v30, %v727_v29 }
 0x15f   :  { %v797_v34 = vadd.f32 %v796_v19, %v728_v2 }
 0x161   :  { %v798_v38 = vadd.f32 %v797_v34, %v729_v35 }
 0x163   :  { %v799_v26 = vadd.f32 %v798_v38, %v730_v36 }
 0x165   :  { %v800_v42 = vadd.f32 %v799_v26, %v731_v39 }
 0x167   :  { %v801_v28 = vrot.slane %v800_v42, 4 }
 0x169   :  { %v802_v24 = vadd.f32 %v801_v28, %v800_v42 }
 0x16b   :  { %v803_v45 = vrot.slane %v802_v24, 2 }
 0x16d   :  { %v804_v14 = vadd.f32 %v803_v45, %v802_v24 }
 0x16f   :  { %v805_v46 = vrot.slane %v804_v14, 1 }
 0x171   :  { %v806_v40 = vadd.f32 %v805_v46, %v804_v14 }
 0x173   :  { %v810_v25 = vsel %vm809_vm3, %v806_v40, %v769_v48 }
 0x174   :  { %v812_v54 = vadd.f32 %v810_v25, %v732_v52 }
 0x176   :  { %813 = vst [vmem:[#allocation2] sm:$0x3] %v812_v54 }
 0x17d   :  { %v817_v47 = vld [vmem:[#allocation2] sm:$0x3] }
 0x17e   :  { %v818_v55 = vmul.f32 0.00390625, %v817_v47 }
 0x180   :  { %v819_v50 = vpack.c.bf16 %v818_v55, %v818_v55 }
 0x182   :  { %1154 = vmatmul.mubr.bf16.vlgmr.msra.gmra.mrb[28].mxu1 %v819_v50 }
 0x255   :  { %v925_v56 = vpop.f32.mrb[28].mxu1 }
 0x256   :  { %v926_v57 = vadd.f32 %v1014_v41, %v925_v56  ;;  %v1155_v49 = vpop.f32.mrb[29].mxu1 }
 0x257   :  { %v928_v60 = vpop.f32.mrb[30].mxu1 }
 0x258   :  { %931 = vst [vmem:[#allocation3] sm:$0x3] %v926_v57  ;;  %v1156_v1 = vpop.f32.mrb[31].mxu1 }
 0x259   :  { %1222 = shalt.err (!%p1219_p4)
}
 0x25a   :  { %s1223_s4 = scalar_lea.hbm %s1616_s5, 32 }
 0x25b   :  { %p1224_p5 = scmp.ne.s32.totalorder %s1616_s5, %s1223_s4  ;;  %p1227_p6 = scmp.lt.u32.totalorder %s1223_s4, %s1616_s5 }
 0x25d   :  { %p1229_p7 = pnand %p1227_p6, %p1224_p5 }
 0x25f   :  { %1232 = shalt.err (!%p1229_p7)
}
 0x260   :  { %941 = dma.vmem_to_hbm [thread:$0]  %s939_s1, 32, %s1616_s5, [#allocation4]  }
 0x261   :  { %1233 = dma.done.wait [#allocation4], 32  }
 0x262   :  { %1234 = vsyncadd [#allocation4], 4294967264 }
 0x263   :  { %945 = vsyncpa [#allocation4], 1 }

</bundles_post_ra>
